<compile_context>
chip_gen: v7x
topology: tpu7x:2x2x1
jax: 0.10.0
libtpu: 0.0.40
codegen_flags: <defaults>
</compile_context>

<pallas_src>
import functools

import jax
import jax.numpy as jnp
from jax.experimental import pallas as pl
from jax.experimental.pallas import tpu as pltpu


def _mlp_kernel(z_ref, w1_ref, b1_ref, w2_ref, b2_ref, w3_ref, o_ref):
    f32 = jnp.float32
    bf16 = jnp.bfloat16
    # Layer 1: single K=48 matmul (bf16 operands, f32 accumulation on the MXU),
    # bias + ReLU + bf16 downcast fused in one expression (VPU).
    h1 = jnp.dot(z_ref[...], w1_ref[...], preferred_element_type=f32)
    h1 = jnp.maximum(h1 + b1_ref[...], 0.0).astype(bf16)
    # Dropout -> identity (eval mode).
    # Layer 2: Linear(512, 128) + ReLU.
    h2 = jnp.dot(h1, w2_ref[...], preferred_element_type=f32)
    h2 = jnp.maximum(h2 + b2_ref[...], 0.0).astype(bf16)
    # Layer 3: Linear(128, 8), no bias.
    o_ref[...] = jnp.dot(h2, w3_ref[...],
                         preferred_element_type=f32).astype(o_ref.dtype)


def _round_up(x, m):
    return ((x + m - 1) // m) * m


def mlp_forward(z0, z1, z2, z3, params, tile_b=2048):
    """Fused MLP kernel over a batch grid with VMEM-resident weights."""
    w1, b1, w2, b2, w3 = params
    B = z0.shape[0]

    bf16 = jnp.bfloat16
    # Fused concat + bf16 cast (single [B, 48] HBM operand; under jit this is
    # one fused write, no extra round trip vs the per-chunk casts).
    z = jnp.concatenate((z0, z1, z2, z3), axis=-1).astype(bf16)
    w1 = w1.astype(bf16)
    w2 = w2.astype(bf16)
    w3 = w3.astype(bf16)
    d_in = z.shape[-1]

    if B <= tile_b:
        if B > 1024:
            # Keep >= 2 grid steps so v7x's second TensorCore gets work.
            tile_b = _round_up(pl.cdiv(B, 2), 8)
        else:
            tile_b = B            # single full-extent row block
    grid = (pl.cdiv(B, tile_b),)

    def rows(d):                  # batch-tiled activations / output
        return pl.BlockSpec((tile_b, d), lambda i: (i, 0))

    def whole(a):                 # weights/biases resident across the grid
        return pl.BlockSpec(a.shape, lambda i: (0, 0))

    out = pl.pallas_call(
        _mlp_kernel,
        out_shape=jax.ShapeDtypeStruct((B, 8), jnp.float32),
        grid=grid,
        in_specs=[rows(d_in),
                  whole(w1), whole(b1), whole(w2), whole(b2), whole(w3)],
        out_specs=rows(8),
        compiler_params=pltpu.CompilerParams(
            dimension_semantics=("parallel",),   # 2 TCs on v7x; no-op v5e/v6e
            vmem_limit_bytes=32 * 1024 * 1024),  # headroom over v5e's 16 MiB default
    )(z, w1, b1, w2, b2, w3)

    return jnp.squeeze(out)       # matches torch .squeeze()


def init_params(key, dim_in_total):
    """Deterministic kaiming-normal-ish init (fan_in, relu) like reset_parameters."""
    k1, k2, k3 = jax.random.split(key, 3)

    def kaiming(k, fan_in, fan_out):
        std = jnp.sqrt(2.0 / fan_in)
        # stored as [in, out] (transposed vs torch's [out, in])
        return jax.random.normal(k, (fan_in, fan_out), jnp.float32) * std

    w1 = kaiming(k1, dim_in_total, 512)
    b1 = jnp.zeros((1, 512), jnp.float32)
    w2 = kaiming(k2, 512, 128)
    b2 = jnp.zeros((1, 128), jnp.float32)
    w3 = kaiming(k3, 128, 8)
    return (w1, b1, w2, b2, w3)


def _reference(z0, z1, z2, z3, params):
    """Pure-JAX f32 reference (eval-mode dropout = identity)."""
    z = jnp.concatenate((z0, z1, z2, z3), axis=-1)
    w1, b1, w2, b2, w3 = params
    h = jnp.maximum(z @ w1 + b1, 0.0)
    h = jnp.maximum(h @ w2 + b2, 0.0)
    return jnp.squeeze(h @ w3)


if __name__ == "__main__":
    # dec == 'concatenate': dim_in_total = 3*dim_in + 3
    # so z0, z1, z2 have dim_in features each and z3 has 3.
    dim_in = 15
    dim_in_total = 3 * dim_in + 3  # = 48

    key = jax.random.PRNGKey(0)
    kz0, kz1, kz2, kz3, kp = jax.random.split(key, 5)
    params = init_params(kp, dim_in_total)

    fwd = jax.jit(mlp_forward, static_argnames="tile_b")

    # --- small batch: single full-extent grid step ---
    B = 8
    z0 = jax.random.normal(kz0, (B, dim_in), jnp.float32)
    z1 = jax.random.normal(kz1, (B, dim_in), jnp.float32)
    z2 = jax.random.normal(kz2, (B, dim_in), jnp.float32)
    z3 = jax.random.normal(kz3, (B, 3), jnp.float32)

    out = fwd(z0, z1, z2, z3, params)
    jax.block_until_ready(out)
    ref = _reference(z0, z1, z2, z3, params)
    assert out.shape == ref.shape == (B, 8)
    assert jnp.allclose(out, ref, atol=5e-2, rtol=5e-2), "small-batch mismatch"

    # --- larger batch: exercises the >=2-step batch grid (megacore path) ---
    Bw = 2048
    z0w = jax.random.normal(kz0, (Bw, dim_in), jnp.float32)
    z1w = jax.random.normal(kz1, (Bw, dim_in), jnp.float32)
    z2w = jax.random.normal(kz2, (Bw, dim_in), jnp.float32)
    z3w = jax.random.normal(kz3, (Bw, 3), jnp.float32)

    outw = fwd(z0w, z1w, z2w, z3w, params)
    jax.block_until_ready(outw)
    refw = _reference(z0w, z1w, z2w, z3w, params)
    assert outw.shape == refw.shape == (Bw, 8)
    assert jnp.allclose(outw, refw, atol=5e-2, rtol=5e-2), "grid-batch mismatch"

    print("KERNEL_OK")
</pallas_src>

<mosaic_0001>
module attributes {stable_mosaic.version = 11 : i64} {
  func.func @_mlp_kernel(%arg0: i32, %arg1: memref<8x48xbf16, #tpu.memory_space<vmem>>, %arg2: memref<48x512xbf16, #tpu.memory_space<vmem>>, %arg3: memref<1x512xf32, #tpu.memory_space<vmem>>, %arg4: memref<512x128xbf16, #tpu.memory_space<vmem>>, %arg5: memref<1x128xf32, #tpu.memory_space<vmem>>, %arg6: memref<128x8xbf16, #tpu.memory_space<vmem>>, %arg7: memref<8x8xf32, #tpu.memory_space<vmem>>) attributes {dimension_semantics = [#tpu.dimension_semantics<parallel>], iteration_bounds = array<i64: 1>, scalar_prefetch = 0 : i64, scratch_operands = 0 : i64, tpu.core_type = #tpu.core_type<tc>, window_params = [{transform_indices = @transform_0, window_bounds = array<i64: 8, 48>}, {pipeline_mode = #tpu.pipeline_mode<synchronous>, transform_indices = @transform_1, window_bounds = array<i64: 48, 512>}, {pipeline_mode = #tpu.pipeline_mode<synchronous>, transform_indices = @transform_2, window_bounds = array<i64: 1, 512>}, {pipeline_mode = #tpu.pipeline_mode<synchronous>, transform_indices = @transform_3, window_bounds = array<i64: 512, 128>}, {pipeline_mode = #tpu.pipeline_mode<synchronous>, transform_indices = @transform_4, window_bounds = array<i64: 1, 128>}, {pipeline_mode = #tpu.pipeline_mode<synchronous>, transform_indices = @transform_5, window_bounds = array<i64: 128, 8>}, {transform_indices = @transform_6, window_bounds = array<i64: 8, 8>}]} {
    %c0 = arith.constant 0 : index
    %c0_0 = arith.constant 0 : index
    %0 = vector.load %arg1[%c0, %c0_0] : memref<8x48xbf16, #tpu.memory_space<vmem>>, vector<8x48xbf16>
    %c0_1 = arith.constant 0 : index
    %c0_2 = arith.constant 0 : index
    %1 = vector.load %arg2[%c0_1, %c0_2] : memref<48x512xbf16, #tpu.memory_space<vmem>>, vector<48x512xbf16>
    %cst = arith.constant dense<0.000000e+00> : vector<8x512xf32>
    %2 = tpu.matmul %0, %1, %cst {dimension_numbers = #tpu.dot_dimension_numbers<[1], [0], [0], [1], [0, 0, 1, 1], [], []>} : vector<8x48xbf16>, vector<48x512xbf16>, vector<8x512xf32> -> vector<8x512xf32>
    %c0_3 = arith.constant 0 : index
    %c0_4 = arith.constant 0 : index
    %3 = vector.load %arg3[%c0_3, %c0_4] : memref<1x512xf32, #tpu.memory_space<vmem>>, vector<1x512xf32>
    %4 = vector.broadcast %3 : vector<1x512xf32> to vector<8x512xf32>
    %5 = arith.addf %2, %4 : vector<8x512xf32>
    %cst_5 = arith.constant 0.000000e+00 : f32
    %6 = vector.broadcast %cst_5 : f32 to vector<8x512xf32>
    %7 = arith.maximumf %5, %6 : vector<8x512xf32>
    %8 = arith.truncf %7 : vector<8x512xf32> to vector<8x512xbf16>
    %c0_6 = arith.constant 0 : index
    %c0_7 = arith.constant 0 : index
    %9 = vector.load %arg4[%c0_6, %c0_7] : memref<512x128xbf16, #tpu.memory_space<vmem>>, vector<512x128xbf16>
    %cst_8 = arith.constant dense<0.000000e+00> : vector<8x128xf32>
    %10 = tpu.matmul %8, %9, %cst_8 {dimension_numbers = #tpu.dot_dimension_numbers<[1], [0], [0], [1], [0, 0, 1, 1], [], []>} : vector<8x512xbf16>, vector<512x128xbf16>, vector<8x128xf32> -> vector<8x128xf32>
    %c0_9 = arith.constant 0 : index
    %c0_10 = arith.constant 0 : index
    %11 = vector.load %arg5[%c0_9, %c0_10] : memref<1x128xf32, #tpu.memory_space<vmem>>, vector<1x128xf32>
    %12 = vector.broadcast %11 : vector<1x128xf32> to vector<8x128xf32>
    %13 = arith.addf %10, %12 : vector<8x128xf32>
    %cst_11 = arith.constant 0.000000e+00 : f32
    %14 = vector.broadcast %cst_11 : f32 to vector<8x128xf32>
    %15 = arith.maximumf %13, %14 : vector<8x128xf32>
    %16 = arith.truncf %15 : vector<8x128xf32> to vector<8x128xbf16>
    %c0_12 = arith.constant 0 : index
    %c0_13 = arith.constant 0 : index
    %17 = vector.load %arg6[%c0_12, %c0_13] : memref<128x8xbf16, #tpu.memory_space<vmem>>, vector<128x8xbf16>
    %cst_14 = arith.constant dense<0.000000e+00> : vector<8x8xf32>
    %18 = tpu.matmul %16, %17, %cst_14 {dimension_numbers = #tpu.dot_dimension_numbers<[1], [0], [0], [1], [0, 0, 1, 1], [], []>} : vector<8x128xbf16>, vector<128x8xbf16>, vector<8x8xf32> -> vector<8x8xf32>
    %c0_15 = arith.constant 0 : index
    %c0_16 = arith.constant 0 : index
    %19 = vector.load %arg7[%c0_15, %c0_16] : memref<8x8xf32, #tpu.memory_space<vmem>>, vector<8x8xf32>
    tpu.vector_store %arg7[%c0_15, %c0_16], %18 {strides = array<i32>} : memref<8x8xf32, #tpu.memory_space<vmem>>, vector<8x8xf32>,
    return
  }
  func.func @transform_0(%arg0: i32) -> (i32, i32) {
    %c0_i32 = arith.constant 0 : i32
    %c0_i32_0 = arith.constant 0 : i32
    return %arg0, %c0_i32 : i32, i32
  }
  func.func @transform_1(%arg0: i32) -> (i32, i32) {
    %c0_i32 = arith.constant 0 : i32
    %c0_i32_0 = arith.constant 0 : i32
    %c0_i32_1 = arith.constant 0 : i32
    return %c0_i32, %c0_i32_0 : i32, i32
  }
  func.func @transform_2(%arg0: i32) -> (i32, i32) {
    %c0_i32 = arith.constant 0 : i32
    %c0_i32_0 = arith.constant 0 : i32
    %c0_i32_1 = arith.constant 0 : i32
    return %c0_i32, %c0_i32_0 : i32, i32
  }
  func.func @transform_3(%arg0: i32) -> (i32, i32) {
    %c0_i32 = arith.constant 0 : i32
    %c0_i32_0 = arith.constant 0 : i32
    %c0_i32_1 = arith.constant 0 : i32
    return %c0_i32, %c0_i32_0 : i32, i32
  }
  func.func @transform_4(%arg0: i32) -> (i32, i32) {
    %c0_i32 = arith.constant 0 : i32
    %c0_i32_0 = arith.constant 0 : i32
    %c0_i32_1 = arith.constant 0 : i32
    return %c0_i32, %c0_i32_0 : i32, i32
  }
  func.func @transform_5(%arg0: i32) -> (i32, i32) {
    %c0_i32 = arith.constant 0 : i32
    %c0_i32_0 = arith.constant 0 : i32
    %c0_i32_1 = arith.constant 0 : i32
    return %c0_i32, %c0_i32_0 : i32, i32
  }
  func.func @transform_6(%arg0: i32) -> (i32, i32) {
    %c0_i32 = arith.constant 0 : i32
    %c0_i32_0 = arith.constant 0 : i32
    return %arg0, %c0_i32 : i32, i32
  }
}

</mosaic_0001>

<bundles_post_ra>
// kernel: mlp_forward.1
= control target key start
LH: loop header
LB: loop body
LE: loop exit
PB: predicated region body
PF: predicated region fallthrough
CT: control target
= control target key end

     0   :  { %v893_v2 = vmov 0   ;;  %vm120_vm0 = vcmask 392192   ;;  %s1111_s0 = inlined_call_operand.vmem [shape: bf16[8,48], index: 0, kind: input, shape index: {}]   ;;  %s1112_s1 = inlined_call_operand.vmem [shape: bf16[48,512], index: 1, kind: input, shape index: {}]   ;;  %s1113_s2 = inlined_call_operand.vmem [shape: f32[1,512], index: 2, kind: input, shape index: {}]   ;;  %s1114_s3 = inlined_call_operand.vmem [shape: bf16[512,128], index: 3, kind: input, shape index: {}]   ;;  %s1115_s4 = inlined_call_operand.vmem [shape: f32[1,128], index: 4, kind: input, shape index: {}]   ;;  %s1116_s5 = inlined_call_operand.vmem [shape: bf16[128,8], index: 5, kind: input, shape index: {}]   ;;  %s1117_s6 = inlined_call_operand.hbm [shape: f32[8,8], index: 6, kind: output, shape index: {}]  }
   0x1   :  { %v811_v0 = vld [vmem:[%s1112_s1 + $0x4] ss:$16 sps:$4 sm:$0xff]   ;;  %v813_v1 = vld [vmem:[%s1112_s1] ss:$16 sps:$4 sm:$0xff]   ;;  %156 = vmatprep.mubr.bf16.mxu1 %v893_v2  ;;  %v822_v7 = vld [vmem:[%s1112_s1 + $0xc] ss:$16 sps:$4 sm:$0xff]  }
   0x2   :  { %124 = vmatprep.subr.bf16.mxu1 %v811_v0  ;;  %v814_v3 = vld [vmem:[%s1112_s1 + $0x24] ss:$16 sps:$4 sm:$0xff]   ;;  %v816_v4 = vld [vmem:[%s1112_s1 + $0x20] ss:$16 sps:$4 sm:$0xff]   ;;  %v820_v9 = vld [vmem:[%s1112_s1 + $0x8] ss:$16 sps:$4 sm:$0xff]  }
   0x3   :  { %125 = vmatpush1.bf16.msra.mxu1 %v813_v1  ;;  %v817_v5 = vld [vmem:[%s1112_s1 + $0x44] ss:$16 sps:$4 sm:$0xff]   ;;  %v819_v6 = vld [vmem:[%s1112_s1 + $0x40] ss:$16 sps:$4 sm:$0xff]   ;;  %v825_v11 = vld [vmem:[%s1112_s1 + $0x2c] ss:$16 sps:$4 sm:$0xff]  }
   0x4   :  { %126 = vmatprep.subr.bf16.mxu1 %v814_v3  ;;  %v25_v8 = vld [vmem:[%s1111_s0] sm:$0xf]  ;;  %v831_v13 = vld [vmem:[%s1114_s3 + $0x48] sm:$0xff]   ;;  %v833_v15 = vld [vmem:[%s1114_s3 + $0x50] sm:$0xff]  }
   0x5   :  { %v829_v10 = vld [vmem:[%s1114_s3 + $0x40] sm:$0xff]   ;;  %v832_v14 = vld [vmem:[%s1114_s3 + $0x8] sm:$0xff]   ;;  %v834_v18 = vld [vmem:[%s1114_s3 + $0x10] sm:$0xff]  }
   0x6   :  { %v830_v12 = vld [vmem:[%s1114_s3] sm:$0xff]   ;;  %734 = vmatprep.subr.bf16.mxu0 %v829_v10  ;;  %v823_v16 = vld [vmem:[%s1112_s1 + $0x28] ss:$16 sps:$4 sm:$0xff]   ;;  %v828_v17 = vld [vmem:[%s1112_s1 + $0x4c] ss:$16 sps:$4 sm:$0xff]  }
   0x7   :  { %127 = vmatpush1.bf16.msra.mxu1 %v816_v4  ;;  %735 = vmatpush3.bf16.msra.mxu0 %v830_v12  ;;  %v835_v19 = vld [vmem:[%s1114_s3 + $0x58] sm:$0xff]   ;;  %v836_v21 = vld [vmem:[%s1114_s3 + $0xc0] sm:$0xff]   ;;  %v840_v25 = vld [vmem:[%s1114_s3 + $0xc8] sm:$0xff]  }
   0x8   :  { %128 = vmatprep.subr.bf16.mxu1 %v817_v5  ;;  %736 = vmatprep.subr.bf16.mxu0 %v831_v13  ;;  %v826_v20 = vld [vmem:[%s1112_s1 + $0x48] ss:$16 sps:$4 sm:$0xff]   ;;  %v839_v23 = vld [vmem:[%s1114_s3 + $0x60] sm:$0xff]   ;;  %v844_v29 = vld [vmem:[%s1114_s3 + $0xd0] sm:$0xff]  }
   0x9   :  { %v837_v22 = vld [vmem:[%s1114_s3 + $0x18] sm:$0xff]   ;;  %v838_v24 = vld [vmem:[%s1114_s3 + $0x80] sm:$0xff]   ;;  %v842_v27 = vld [vmem:[%s1114_s3 + $0x88] sm:$0xff]  }
   0xa   :  { %v841_v26 = vld [vmem:[%s1114_s3 + $0x20] sm:$0xff]   ;;  %v843_v28 = vld [vmem:[%s1114_s3 + $0x68] sm:$0xff]   ;;  %v846_v31 = vld [vmem:[%s1114_s3 + $0x90] sm:$0xff]  }
   0xb   :  { %129 = vmatpush1.bf16.msra.mxu1 %v819_v6  ;;  %737 = vmatpush3.bf16.msra.mxu0 %v832_v14  ;;  %v845_v30 = vld [vmem:[%s1114_s3 + $0x28] sm:$0xff]  }
   0xc   :  { %165 = vmatprep.subr.bf16.mxu1 %v822_v7  ;;  %738 = vmatprep.subr.bf16.mxu0 %v833_v15 }
   0xe   :  { %691 = vmatmul.mubr.msk.bf16.vlgmr.msra.gmra.mrb[0].mxu1 %vm120_vm0, %v25_v8 }
   0xf   :  { %166 = vmatpush1.bf16.msra.mxu1 %v820_v9  ;;  %197 = vmatprep.mubr.bf16.mxu1 %v893_v2 }
  0x10   :  { %167 = vmatprep.subr.bf16.mxu1 %v825_v11  ;;  %739 = vmatpush3.bf16.msra.mxu0 %v834_v18 }
  0x11   :  { %740 = vmatprep.subr.bf16.mxu0 %v835_v19 }
  0x13   :  { %168 = vmatpush1.bf16.msra.mxu1 %v823_v16 }
  0x14   :  { %169 = vmatprep.subr.bf16.mxu1 %v828_v17  ;;  %741 = vmatpush3.bf16.msra.mxu0 %v837_v22 }
  0x15   :  { %742 = vmatprep.subr.bf16.mxu0 %v839_v23 }
  0x17   :  { %170 = vmatpush1.bf16.msra.mxu1 %v826_v20 }
  0x18   :  { %756 = vmatprep.subr.bf16.mxu1 %v836_v21  ;;  %743 = vmatpush3.bf16.msra.mxu0 %v841_v26 }
  0x19   :  { %744 = vmatprep.subr.bf16.mxu0 %v843_v28 }
  0x1a   :  { %692 = vmatmul.mubr.msk.bf16.vlgmr.msra.gmra.mrb[4].mxu1 %vm120_vm0, %v25_v8 }
  0x1b   :  { %757 = vmatpush3.bf16.msra.mxu1 %v838_v24 }
  0x1c   :  { %758 = vmatprep.subr.bf16.mxu1 %v840_v25  ;;  %745 = vmatpush3.bf16.msra.mxu0 %v845_v30 }
  0x1f   :  { %759 = vmatpush3.bf16.msra.mxu1 %v842_v27 }
  0x20   :  { %760 = vmatprep.subr.bf16.mxu1 %v844_v29 }
  0x23   :  { %761 = vmatpush3.bf16.msra.mxu1 %v846_v31 }
  0x24   :  { %11 = vsyncpa [#allocation3], 0  ;;  %v847_v32 = vld [vmem:[%s1114_s3 + $0x70] sm:$0xff]   ;;  %v848_v33 = vld [vmem:[%s1114_s3 + $0xd8] sm:$0xff]   ;;  %v894_v46 = vmov 0.0   ;;  %v40_v47 = vlaneseq  ;;  %vm895_vm1 = vmmov 0  }
  0x25   :  { %v849_v34 = vld [vmem:[%s1114_s3 + $0x30] sm:$0xff]   ;;  %v850_v35 = vld [vmem:[%s1114_s3 + $0x98] sm:$0xff]   ;;  %746 = vmatprep.subr.bf16.mxu0 %v847_v32  ;;  %762 = vmatprep.subr.bf16.mxu1 %v848_v33  ;;  %v852_v37 = vld [vmem:[%s1114_s3 + $0xe0] sm:$0xff]   ;;  %vm663_vm2 = vcmask 64512  }
  0x26   :  { %747 = vmatpush3.bf16.msra.mxu0 %v849_v34  ;;  %v851_v36 = vld [vmem:[%s1114_s3 + $0x78] sm:$0xff]   ;;  %v854_v39 = vld [vmem:[%s1114_s3 + $0xa0] sm:$0xff]   ;;  %v855_v40 = vld [vmem:[%s1114_s3 + $0xe8] sm:$0xff]   ;;  %v41_v48 = vshrl.u32 %v40_v47, 7 }
  0x27   :  { %763 = vmatpush3.bf16.msra.mxu1 %v850_v35  ;;  %v853_v38 = vld [vmem:[%s1114_s3 + $0x38] sm:$0xff]   ;;  %748 = vmatprep.subr.bf16.mxu0 %v851_v36  ;;  %v856_v41 = vld [vmem:[%s1114_s3 + $0xa8] sm:$0xff]   ;;  %v857_v42 = vld [vmem:[%s1114_s3 + $0xf0] sm:$0xff]  }
  0x28   :  { %764 = vmatprep.subr.bf16.mxu1 %v852_v37  ;;  %v858_v43 = vld [vmem:[%s1114_s3 + $0xb0] sm:$0xff]   ;;  %v859_v44 = vld [vmem:[%s1114_s3 + $0xf8] sm:$0xff]   ;;  %v42_v49 = vsub.s32 0, %v41_v48  ;;  %v38_v50 = vld [vmem:[%s1113_s2] sm:$0xf]  ;;  %v46_v51 = vsub.s32 1, %v41_v48 }
  0x29   :  { %v860_v45 = vld [vmem:[%s1114_s3 + $0xb8] sm:$0xff]   ;;  %v50_v63 = vsub.s32 2, %v41_v48  ;;  %v54_v1 = vsub.s32 3, %v41_v48  ;;  %v861_v2 = vld [vmem:[%s1116_s5] sm:$0xff]   ;;  %v862_v5 = vld [vmem:[%s1116_s5 + $0x8] sm:$0xff]  }
  0x2a   :  { %749 = vmatpush3.bf16.msra.mxu0 %v853_v38  ;;  %v43_v52 = vrot.slane %v38_v50, %v42_v49  ;;  %v47_v53 = vrot.slane %v38_v50, %v46_v51  ;;  %v863_v11 = vld [vmem:[%s1116_s5 + $0x10] sm:$0xff]   ;;  %v864_v17 = vld [vmem:[%s1116_s5 + $0x18] sm:$0xff]   ;;  %v865_v18 = vld [vmem:[%s1116_s5 + $0x20] sm:$0xff]  }
  0x2b   :  { %765 = vmatpush3.bf16.msra.mxu1 %v854_v39  ;;  %787 = vmatprep.subr.bf16.mxu0 %v894_v46  ;;  %v51_v3 = vrot.slane %v38_v50, %v50_v63  ;;  %v55_v4 = vrot.slane %v38_v50, %v54_v1  ;;  %v866_v19 = vld [vmem:[%s1116_s5 + $0x28] sm:$0xff]   ;;  %v867_v20 = vld [vmem:[%s1116_s5 + $0x30] sm:$0xff]   ;;  %v868_v21 = vld [vmem:[%s1116_s5 + $0x38] sm:$0xff]   ;;  %s896_s5 = smov [#allocation2]  }
  0x2c   :  { %766 = vmatprep.subr.bf16.mxu1 %v855_v40  ;;  %v693_v27 = vld [vmem:[%s1115_s4] ss:$0 sm:$0xff]  ;;  %s671_s26 = sshll.u32 %s896_s5, 4  ;;  %s672_s26 = int_to_ptr.vmem [resolvable:$true] %s671_s26 }
  0x2d   :  { %s869_s27 = scalar_lea.vmem %s672_s26, 128  ;;  %p874_p1 = scmp.lt.s32.totalorder %s672_s26, %s672_s26 }
  0x2e   :  { %p870_p0 = scmp.ne.s32.totalorder %s672_s26, %s869_s27  ;;  %p875_p2 = scmp.lt.s32.totalorder %s869_s27, %s869_s27 }
  0x2f   :  { %767 = vmatpush3.bf16.msra.mxu1 %v856_v41 }
  0x30   :  { %768 = vmatprep.subr.bf16.mxu1 %v857_v42  ;;  %p876_p3 = por %p875_p2, %p874_p1 }
  0x32   :  { %p877_p4 = pnand %p876_p3, %p870_p0 }
  0x33   :  { %769 = vmatpush3.bf16.msra.mxu1 %v858_v43 }
  0x34   :  { %770 = vmatprep.subr.bf16.mxu1 %v859_v44 }
  0x37   :  { %771 = vmatpush3.bf16.msra.mxu1 %v860_v45 }
  0xe1   :  { %v158_v54 = vpop.f32.mrb[0].mxu1 }
  0xe2   :  { %v159_v55 = vadd.f32 %v158_v54, %v43_v52  ;;  %v160_v56 = vpop.f32.mrb[1].mxu1 }
  0xe3   :  { %v161_v57 = vadd.f32 %v160_v56, %v47_v53  ;;  %v162_v58 = vpop.f32.mrb[2].mxu1 }
  0xe4   :  { %v206_v59 = vmax.f32 %v159_v55, 0.0  ;;  %v163_v60 = vpop.f32.mrb[3].mxu1 }
  0xe5   :  { %v207_v61 = vmax.f32 %v161_v57, 0.0 }
  0xe6   :  { %v210_v62 = vpack.c.bf16 %v206_v59, %v206_v59 }
  0xe7   :  { %v211_v0 = vpack.c.bf16 %v207_v61, %v207_v61 }
  0xe9   :  { %509 = vmatprep.mubr.bf16.mxu0 %v211_v0 }
  0xea   :  { %510 = vmatmul.mubr.bf16.vlgmr.msra.gmra.mrb[0].mxu0 %v210_v62 }
  0xeb   :  { %788 = vmatpush3.bf16.msra.mxu0 %v861_v2  ;;  %803 = vmatprep.mubr.msk.bf16.mxu0 %vm895_vm1, %v894_v46 }
  0xec   :  { %789 = vmatprep.subr.bf16.mxu0 %v894_v46 }
  0xed   :  { %v199_v6 = vpop.f32.mrb[4].mxu1 }
  0xee   :  { %v200_v7 = vadd.f32 %v199_v6, %v51_v3  ;;  %v201_v8 = vpop.f32.mrb[5].mxu1 }
  0xef   :  { %v202_v9 = vadd.f32 %v201_v8, %v55_v4  ;;  %v203_v10 = vpop.f32.mrb[6].mxu1  ;;  %790 = vmatpush3.bf16.msra.mxu0 %v862_v5 }
  0xf0   :  { %v208_v12 = vmax.f32 %v200_v7, 0.0  ;;  %v204_v13 = vpop.f32.mrb[7].mxu1  ;;  %791 = vmatprep.subr.bf16.mxu0 %v894_v46 }
  0xf1   :  { %v209_v14 = vmax.f32 %v202_v9, 0.0 }
  0xf2   :  { %v212_v16 = vpack.c.bf16 %v208_v12, %v208_v12 }
  0xf3   :  { %v213_v15 = vpack.c.bf16 %v209_v14, %v209_v14  ;;  %792 = vmatpush3.bf16.msra.mxu0 %v863_v11 }
  0xf4   :  { %793 = vmatprep.subr.bf16.mxu0 %v894_v46 }
  0xf5   :  { %549 = vmatprep.mubr.bf16.mxu1 %v213_v15 }
  0xf6   :  { %550 = vmatmul.mubr.bf16.vlgmr.msra.gmra.mrb[8].mxu1 %v212_v16 }
  0xf7   :  { %794 = vmatpush3.bf16.msra.mxu0 %v864_v17 }
  0xf8   :  { %795 = vmatprep.subr.bf16.mxu0 %v894_v46 }
  0xfb   :  { %796 = vmatpush3.bf16.msra.mxu0 %v865_v18 }
  0xfc   :  { %797 = vmatprep.subr.bf16.mxu0 %v894_v46 }
  0xff   :  { %798 = vmatpush3.bf16.msra.mxu0 %v866_v19 }
 0x100   :  { %799 = vmatprep.subr.bf16.mxu0 %v894_v46 }
 0x103   :  { %800 = vmatpush3.bf16.msra.mxu0 %v867_v20 }
 0x104   :  { %801 = vmatprep.subr.bf16.mxu0 %v894_v46 }
 0x107   :  { %802 = vmatpush3.bf16.msra.mxu0 %v868_v21 }
 0x1bd   :  { %v750_v22 = vpop.f32.mrb[0].mxu0 }
 0x1be   :  { %v751_v23 = vpop.f32.mrb[1].mxu0 }
 0x1bf   :  { %v752_v24 = vadd.f32 %v751_v23, %v750_v22  ;;  %v753_v25 = vpop.f32.mrb[2].mxu0 }
 0x1c0   :  { %v754_v26 = vpop.f32.mrb[3].mxu0 }
 0x1c1   :  { %v512_v30 = vadd.f32 %v752_v24, %v693_v27 }
 0x1c9   :  { %v772_v28 = vpop.f32.mrb[8].mxu1 }
 0x1ca   :  { %v773_v29 = vpop.f32.mrb[9].mxu1 }
 0x1cb   :  { %v774_v31 = vadd.f32 %v773_v29, %v772_v28  ;;  %v775_v32 = vpop.f32.mrb[10].mxu1 }
 0x1cc   :  { %v776_v33 = vpop.f32.mrb[11].mxu1 }
 0x1cd   :  { %v552_v34 = vadd.f32 %v774_v31, %v512_v30 }
 0x1cf   :  { %v557_v35 = vmax.f32 %v552_v34, 0.0 }
 0x1d1   :  { %v558_v36 = vpack.c.bf16 %v557_v35, %v557_v35 }
 0x1d3   :  { %804 = vmatmul.mubr.bf16.vlgmr.msra.gmra.mrb[4].mxu0 %v558_v36 }
 0x2a6   :  { %v657_v37 = vpop.f32.mrb[4].mxu0 }
 0x2a7   :  { %664 = vst.msk [vmem:[#allocation2] sm:$0xff] %vm663_vm2, %v657_v37  ;;  %v805_v38 = vpop.f32.mrb[5].mxu0 }
 0x2a8   :  { %v660_v39 = vpop.f32.mrb[6].mxu0 }
 0x2a9   :  { %880 = shalt.err (!%p877_p4)
}
 0x2aa   :  { %s881_s29 = scalar_lea.hbm %s1117_s6, 128 }
 0x2ab   :  { %p882_p5 = scmp.ne.s32.totalorder %s1117_s6, %s881_s29  ;;  %p885_p6 = scmp.lt.u32.totalorder %s881_s29, %s1117_s6 }
 0x2ad   :  { %p887_p7 = pnand %p885_p6, %p882_p5 }
 0x2af   :  { %890 = shalt.err (!%p887_p7)
}
 0x2b0   :  { %674 = dma.vmem_to_hbm [thread:$0]  %s672_s26, 128, %s1117_s6, [#allocation3]   ;;  %v806_v40 = vpop.f32.mrb[7].mxu0 }
 0x2b1   :  { %891 = dma.done.wait [#allocation3], 128  }
 0x2b2   :  { %892 = vsyncadd [#allocation3], 4294967168 }
 0x2b3   :  { %678 = vsyncpa [#allocation3], 1 }

</bundles_post_ra>
